<compile_context>
chip_gen: v7x
topology: tpu7x:2x2x1
jax: 0.10.0
libtpu: 0.0.40
codegen_flags: <defaults>
</compile_context>

<pallas_src>
import functools

import numpy as np
import jax
import jax.numpy as jnp
from jax.experimental import pallas as pl
from jax.experimental.pallas import tpu as pltpu


# ----------------------------------------------------------------------------
# Host-side helpers (static per-shape precomputation).
# ----------------------------------------------------------------------------
def _round_up(x, m):
    return ((x + m - 1) // m) * m


def _tap_shifts(W, n_lanes):
    """Lane-roll amount for each of the 9 taps of a 3x3 / pad=1 conv (kh-major)."""
    shifts = []
    for k in range(9):
        dh, dw = k // 3 - 1, k % 3 - 1
        d = dh * W + dw                      # source offset along flattened H*W
        shifts.append((-d) % n_lanes)
    return tuple(shifts)


def _host_masks(H, W, images_per_block):
    """(9, images_per_block*H*W) f32 border masks, precomputed on the host.

    Mask k zeroes every lane whose tap-k source pixel falls in the virtual zero
    padding of its OWN image, so roll wrap-around (including across packed
    image boundaries) never leaks pixels.
    """
    HW = H * W
    lane = np.arange(HW)
    hh, ww = lane // W, lane % W
    m = np.empty((9, HW), np.float32)
    for k in range(9):
        dh, dw = k // 3 - 1, k % 3 - 1
        valid = (hh + dh >= 0) & (hh + dh < H) & (ww + dw >= 0) & (ww + dw < W)
        m[k] = valid.astype(np.float32)
    return jnp.asarray(np.tile(m, (1, images_per_block)))


def _prep_weight(w_oihw, cin_pad):
    """(Cout, Cin, 3, 3) -> (Cout, 9*cin_pad); column = (kh*3+kw)*cin_pad + cin."""
    cout, cin = w_oihw.shape[:2]
    w = jnp.transpose(w_oihw, (0, 2, 3, 1))                     # (O, kh, kw, I)
    if cin_pad != cin:
        w = jnp.pad(w, ((0, 0), (0, 0), (0, 0), (0, cin_pad - cin)))
    return w.reshape(cout, 9 * cin_pad).astype(jnp.float32)


# ----------------------------------------------------------------------------
# In-kernel helpers (traced inline inside the Pallas kernels).
# ----------------------------------------------------------------------------
def _conv3x3_bias_relu(x, m, w_ref, b, shifts, stack_ref, cin):
    """Merged-tap, lane-dense 3x3 conv + bias + ReLU.

    x:         (cin, N) f32 value (N = images_per_block*H*W on the lane axis)
    m:         (9, N) f32 border masks (host-precomputed)
    w_ref:     (cout, 9*cin) VMEM ref (merged tap-major weights)
    b:         (cout, 1) f32 value
    stack_ref: (9*cin, N) f32 VMEM scratch (im2col stack)
    returns    (cout, N) f32
    """
    for k, shift in enumerate(shifts):
        xs = x if shift == 0 else pltpu.roll(x, shift, axis=1)   # XLU rotation
        if k != 4:                                               # center tap: no border
            xs = xs * m[k:k + 1, :]                              # emulate zero padding
        stack_ref[k * cin:(k + 1) * cin, :] = xs                 # tile-aligned store
    # ONE MXU matmul per layer: (cout, 9*cin) @ (9*cin, N), f32 accumulation.
    y = jnp.dot(w_ref[...], stack_ref[...], preferred_element_type=jnp.float32)
    return jnp.maximum(y + b, 0.0)


def _one_layer_kernel(shifts, cin, x_ref, m_ref, w1_ref, b1_ref, a1_ref, s1_ref):
    a1 = _conv3x3_bias_relu(x_ref[0].astype(jnp.float32), m_ref[...],
                            w1_ref, b1_ref[...], shifts, s1_ref, cin)
    a1_ref[0] = a1.astype(a1_ref.dtype)


def _two_layer_kernel(shifts, cin, cmid, write_a1,
                      x_ref, m_ref, w1_ref, b1_ref, w2_ref, b2_ref, *rest):
    if write_a1:
        a1_ref, a2_ref, s1_ref, s2_ref = rest
    else:
        a2_ref, s1_ref, s2_ref = rest
    m = m_ref[...]
    a1 = _conv3x3_bias_relu(x_ref[0].astype(jnp.float32), m, w1_ref, b1_ref[...],
                            shifts, s1_ref, cin)
    if write_a1:
        a1_ref[0] = a1.astype(a1_ref.dtype)
    # act1 stays on-chip for layer 2 -- no HBM round trip (and no writeback at
    # all when only act2 was requested).
    a2 = _conv3x3_bias_relu(a1, m, w2_ref, b2_ref[...], shifts, s2_ref, cmid)
    a2_ref[0] = a2.astype(a2_ref.dtype)


# ----------------------------------------------------------------------------
# Host-side wrapper: layout prep + pallas_call.
# ----------------------------------------------------------------------------
def tiny_cnn_extract(x_nchw, params, *, need_act1=True, need_act2=True,
                     lane_blocks=None):
    """Runs the tiny 2-layer CNN; returns requested features in NCHW."""
    assert need_act1 or need_act2
    B, Cin, H, W = x_nchw.shape
    HW = H * W
    Cin_p = _round_up(Cin, 8)        # sublane-align layer-1 K (zero weights -> no effect)

    # Grid steps: default 2 keeps both v7x TensorCores busy (grid axis marked
    # "parallel"); pass lane_blocks=1 on v5e/v6e to collapse to a single step.
    if lane_blocks is None:
        lane_blocks = 2 if (B >= 2 and B % 2 == 0) else 1
    assert B % lane_blocks == 0, "lane_blocks must divide batch"
    bpg = B // lane_blocks           # images packed on the lane axis per grid step
    N = bpg * HW                     # lane width per block

    # Lane-dense slab: channels on sublanes, batch*H*W on lanes.
    xf = x_nchw.reshape(B, Cin, HW)
    if Cin_p != Cin:
        xf = jnp.pad(xf, ((0, 0), (0, Cin_p - Cin), (0, 0)))
    # (B, Cin_p, HW) -> (lane_blocks, Cin_p, bpg*HW); transpose is a no-op when bpg == 1.
    xf = (xf.reshape(lane_blocks, bpg, Cin_p, HW)
            .transpose(0, 2, 1, 3)
            .reshape(lane_blocks, Cin_p, N))

    masks = _host_masks(H, W, bpg)               # (9, N) f32, host-precomputed
    shifts = _tap_shifts(W, N)

    w1 = _prep_weight(params["conv1_w"], Cin_p)  # (Cmid, 9*Cin_p)
    Cmid = w1.shape[0]
    b1 = params["conv1_b"].reshape(Cmid, 1).astype(jnp.float32)

    dt = x_nchw.dtype
    const = lambda bi: (0, 0)
    per_img = lambda c: pl.BlockSpec((1, c, N), lambda bi: (bi, 0, 0))
    cparams = pltpu.CompilerParams(dimension_semantics=("parallel",))

    def unflatten(y, C):
        # (lane_blocks, C, bpg*HW) -> (B, C, H, W); transpose is a no-op when bpg == 1.
        return (y.reshape(lane_blocks, C, bpg, H, W)
                 .transpose(0, 2, 1, 3, 4)
                 .reshape(B, C, H, W))

    if not need_act2:
        a1 = pl.pallas_call(
            functools.partial(_one_layer_kernel, shifts, Cin_p),
            out_shape=jax.ShapeDtypeStruct((lane_blocks, Cmid, N), dt),
            grid_spec=pltpu.PrefetchScalarGridSpec(
                num_scalar_prefetch=0,
                grid=(lane_blocks,),
                in_specs=[
                    per_img(Cin_p),
                    pl.BlockSpec((9, N), const),
                    pl.BlockSpec((Cmid, 9 * Cin_p), const),
                    pl.BlockSpec((Cmid, 1), const),
                ],
                out_specs=per_img(Cmid),
                scratch_shapes=[pltpu.VMEM((9 * Cin_p, N), jnp.float32)],
            ),
            compiler_params=cparams,
            cost_estimate=pl.CostEstimate(
                flops=2 * B * HW * 9 * Cin_p * Cmid,
                transcendentals=0,
                bytes_accessed=4 * (xf.size + masks.size + w1.size + b1.size
                                    + B * Cmid * HW),
            ),
        )(xf, masks, w1, b1)
        return {"act1": unflatten(a1, Cmid)}

    w2 = _prep_weight(params["conv2_w"], Cmid)   # (Cout, 9*Cmid)
    Cout = w2.shape[0]
    b2 = params["conv2_b"].reshape(Cout, 1).astype(jnp.float32)

    if need_act1:
        out_shape = (jax.ShapeDtypeStruct((lane_blocks, Cmid, N), dt),
                     jax.ShapeDtypeStruct((lane_blocks, Cout, N), dt))
        out_specs = [per_img(Cmid), per_img(Cout)]
        out_elems = B * HW * (Cmid + Cout)
    else:
        # act1 never touches HBM when only act2 is requested.
        out_shape = jax.ShapeDtypeStruct((lane_blocks, Cout, N), dt)
        out_specs = per_img(Cout)
        out_elems = B * HW * Cout

    outs = pl.pallas_call(
        functools.partial(_two_layer_kernel, shifts, Cin_p, Cmid, need_act1),
        out_shape=out_shape,
        grid_spec=pltpu.PrefetchScalarGridSpec(
            num_scalar_prefetch=0,
            grid=(lane_blocks,),
            in_specs=[
                per_img(Cin_p),
                pl.BlockSpec((9, N), const),
                pl.BlockSpec((Cmid, 9 * Cin_p), const),
                pl.BlockSpec((Cmid, 1), const),
                pl.BlockSpec((Cout, 9 * Cmid), const),
                pl.BlockSpec((Cout, 1), const),
            ],
            out_specs=out_specs,
            scratch_shapes=[pltpu.VMEM((9 * Cin_p, N), jnp.float32),
                            pltpu.VMEM((9 * Cmid, N), jnp.float32)],
        ),
        compiler_params=cparams,
        cost_estimate=pl.CostEstimate(
            flops=2 * B * HW * 9 * (Cin_p * Cmid + Cmid * Cout),
            transcendentals=0,
            bytes_accessed=4 * (xf.size + masks.size + w1.size + b1.size
                                + w2.size + b2.size + out_elems),
        ),
    )(xf, masks, w1, b1, w2, b2)

    if need_act1:
        a1, a2 = outs
        return {"act1": unflatten(a1, Cmid), "act2": unflatten(a2, Cout)}
    return {"act2": unflatten(outs, Cout)}


# ----------------------------------------------------------------------------
# GraphExtractNet: dict -> list / single tensor wrapper (timm semantics).
# ----------------------------------------------------------------------------
class GraphExtractNet:
    """JAX equivalent of timm's GraphExtractNet wrapping the tiny 2-layer CNN.

    Graph nodes available for extraction:
      "act1": post conv1+ReLU, NCHW (B, 8, H, W)
      "act2": post conv2+ReLU, NCHW (B, 16, H, W)
    """

    _NODES = ("act1", "act2")

    def __init__(self, params, return_nodes, squeeze_out=True, return_dict=False):
        self.params = params
        if isinstance(return_nodes, dict):
            self.return_nodes = dict(return_nodes)
        else:
            self.return_nodes = {n: n for n in return_nodes}
        unknown = set(self.return_nodes) - set(self._NODES)
        if unknown:
            raise ValueError(f"unknown graph nodes requested: {sorted(unknown)}")
        self.squeeze_out = squeeze_out
        self.return_dict = return_dict

    def _graph_module(self, x):
        # Only run the layers / write the features that were actually requested.
        need_act1 = "act1" in self.return_nodes
        need_act2 = "act2" in self.return_nodes
        feats = tiny_cnn_extract(x, self.params,
                                 need_act1=need_act1, need_act2=need_act2)
        return {out_name: feats[node] for node, out_name in self.return_nodes.items()}

    def __call__(self, x):
        out = self._graph_module(x)
        if self.return_dict:
            return out
        out = list(out.values())
        return out[0] if self.squeeze_out and len(out) == 1 else out


# ----------------------------------------------------------------------------
# Reference + self-test.
# ----------------------------------------------------------------------------
def _ref_conv_relu(x, w, b):
    y = jax.lax.conv_general_dilated(
        x, w, window_strides=(1, 1), padding="SAME",
        dimension_numbers=("NCHW", "OIHW", "NCHW"))
    return jnp.maximum(y + b.reshape(1, -1, 1, 1), 0.0)


if __name__ == "__main__":
    key = jax.random.PRNGKey(0)
    kx, k1, k2, k3, k4 = jax.random.split(key, 5)

    B, Cin, H, W = 2, 4, 16, 16
    Cmid, Cout = 8, 16

    x = jax.random.normal(kx, (B, Cin, H, W), dtype=jnp.float32)
    params = {
        "conv1_w": 0.1 * jax.random.normal(k1, (Cmid, Cin, 3, 3), dtype=jnp.float32),
        "conv1_b": 0.1 * jax.random.normal(k2, (Cmid,), dtype=jnp.float32),
        "conv2_w": 0.1 * jax.random.normal(k3, (Cout, Cmid, 3, 3), dtype=jnp.float32),
        "conv2_b": 0.1 * jax.random.normal(k4, (Cout,), dtype=jnp.float32),
    }

    ref1 = _ref_conv_relu(x, params["conv1_w"], params["conv1_b"])
    ref2 = _ref_conv_relu(ref1, params["conv2_w"], params["conv2_b"])

    # Multi-node extraction -> list of tensors (squeeze_out has no effect, len > 1).
    net_multi = GraphExtractNet(params, return_nodes=["act1", "act2"], squeeze_out=True)
    feats = jax.block_until_ready(net_multi(x))
    assert isinstance(feats, list) and len(feats) == 2
    assert feats[0].shape == (B, Cmid, H, W)
    assert feats[1].shape == (B, Cout, H, W)

    # Single deep node + squeeze_out -> single tensor (fused 2-layer kernel,
    # act1 never written to HBM).
    net_single = GraphExtractNet(params, return_nodes=["act2"], squeeze_out=True)
    single = jax.block_until_ready(net_single(x))
    assert single.shape == (B, Cout, H, W)

    # Single shallow node -> only the 1-layer kernel runs.
    net_a1 = GraphExtractNet(params, return_nodes=["act1"], squeeze_out=True)
    a1_only = jax.block_until_ready(net_a1(x))
    assert a1_only.shape == (B, Cmid, H, W)

    # Dict output mode.
    net_dict = GraphExtractNet(params, return_nodes={"act1": "f1", "act2": "f2"},
                               return_dict=True)
    d = jax.block_until_ready(net_dict(x))
    assert set(d.keys()) == {"f1", "f2"}

    # Fully lane-collapsed single-step variant (batch packed on the lane axis):
    # validates that per-image masks keep roll wrap from leaking across images.
    packed = jax.block_until_ready(
        tiny_cnn_extract(x, params, need_act1=True, need_act2=True, lane_blocks=1))

    # Correctness vs XLA conv reference.
    np.testing.assert_allclose(np.asarray(feats[0]), np.asarray(ref1), rtol=1e-4, atol=1e-4)
    np.testing.assert_allclose(np.asarray(feats[1]), np.asarray(ref2), rtol=1e-4, atol=1e-4)
    np.testing.assert_allclose(np.asarray(single), np.asarray(ref2), rtol=1e-4, atol=1e-4)
    np.testing.assert_allclose(np.asarray(a1_only), np.asarray(ref1), rtol=1e-4, atol=1e-4)
    np.testing.assert_allclose(np.asarray(d["f1"]), np.asarray(ref1), rtol=1e-4, atol=1e-4)
    np.testing.assert_allclose(np.asarray(d["f2"]), np.asarray(ref2), rtol=1e-4, atol=1e-4)
    np.testing.assert_allclose(np.asarray(packed["act1"]), np.asarray(ref1), rtol=1e-4, atol=1e-4)
    np.testing.assert_allclose(np.asarray(packed["act2"]), np.asarray(ref2), rtol=1e-4, atol=1e-4)

    print("KERNEL_OK")
</pallas_src>

<mosaic_0001>
module attributes {stable_mosaic.version = 11 : i64} {
  func.func @_two_layer_kernel(%arg0: i32, %arg1: memref<1x8x256xf32, #tpu.memory_space<vmem>>, %arg2: memref<9x256xf32, #tpu.memory_space<vmem>>, %arg3: memref<8x72xf32, #tpu.memory_space<vmem>>, %arg4: memref<8x1xf32, #tpu.memory_space<vmem>>, %arg5: memref<16x72xf32, #tpu.memory_space<vmem>>, %arg6: memref<16x1xf32, #tpu.memory_space<vmem>>, %arg7: memref<1x8x256xf32, #tpu.memory_space<vmem>>, %arg8: memref<1x16x256xf32, #tpu.memory_space<vmem>>, %arg9: memref<72x256xf32, #tpu.memory_space<vmem>>, %arg10: memref<72x256xf32, #tpu.memory_space<vmem>>) attributes {dimension_semantics = [#tpu.dimension_semantics<parallel>], iteration_bounds = array<i64: 2>, scalar_prefetch = 0 : i64, scratch_operands = 2 : i64, tpu.core_type = #tpu.core_type<tc>, window_params = [{transform_indices = @transform_0, window_bounds = array<i64: 1, 8, 256>}, {pipeline_mode = #tpu.pipeline_mode<synchronous>, transform_indices = @transform_1, window_bounds = array<i64: 9, 256>}, {pipeline_mode = #tpu.pipeline_mode<synchronous>, transform_indices = @transform_2, window_bounds = array<i64: 8, 72>}, {pipeline_mode = #tpu.pipeline_mode<synchronous>, transform_indices = @transform_3, window_bounds = array<i64: 8, 1>}, {pipeline_mode = #tpu.pipeline_mode<synchronous>, transform_indices = @transform_4, window_bounds = array<i64: 16, 72>}, {pipeline_mode = #tpu.pipeline_mode<synchronous>, transform_indices = @transform_5, window_bounds = array<i64: 16, 1>}, {transform_indices = @transform_6, window_bounds = array<i64: 1, 8, 256>}, {transform_indices = @transform_7, window_bounds = array<i64: 1, 16, 256>}]} {
    %c0 = arith.constant 0 : index
    %c0_0 = arith.constant 0 : index
    %0 = vector.load %arg2[%c0, %c0_0] : memref<9x256xf32, #tpu.memory_space<vmem>>, vector<9x256xf32>
    %c0_1 = arith.constant 0 : index
    %c0_2 = arith.constant 0 : index
    %c0_3 = arith.constant 0 : index
    %1 = vector.load %arg1[%c0_1, %c0_2, %c0_3] : memref<1x8x256xf32, #tpu.memory_space<vmem>>, vector<1x8x256xf32>
    %2 = vector.shape_cast %1 : vector<1x8x256xf32> to vector<8x256xf32>
    %c0_4 = arith.constant 0 : index
    %c0_5 = arith.constant 0 : index
    %3 = vector.load %arg4[%c0_4, %c0_5] : memref<8x1xf32, #tpu.memory_space<vmem>>, vector<8x1xf32>
    %c17_i32 = arith.constant 17 : i32
    %4 = tpu.dynamic_rotate %2 by %c17_i32 dim 1 : vector<8x256xf32>, i32 -> vector<8x256xf32>
    %5 = vector.extract_strided_slice %0 {offsets = [0, 0], sizes = [1, 256], strides = [1, 1]} : vector<9x256xf32> to vector<1x256xf32>
    %6 = vector.broadcast %5 : vector<1x256xf32> to vector<8x256xf32>
    %7 = arith.mulf %4, %6 : vector<8x256xf32>
    %c0_6 = arith.constant 0 : index
    %c0_7 = arith.constant 0 : index
    %8 = vector.load %arg9[%c0_6, %c0_7] : memref<72x256xf32, #tpu.memory_space<vmem>>, vector<8x256xf32>
    tpu.vector_store %arg9[%c0_6, %c0_7], %7 {strides = array<i32>} : memref<72x256xf32, #tpu.memory_space<vmem>>, vector<8x256xf32>,
    %c16_i32 = arith.constant 16 : i32
    %9 = tpu.dynamic_rotate %2 by %c16_i32 dim 1 : vector<8x256xf32>, i32 -> vector<8x256xf32>
    %10 = vector.extract_strided_slice %0 {offsets = [1, 0], sizes = [1, 256], strides = [1, 1]} : vector<9x256xf32> to vector<1x256xf32>
    %11 = vector.broadcast %10 : vector<1x256xf32> to vector<8x256xf32>
    %12 = arith.mulf %9, %11 : vector<8x256xf32>
    %c8 = arith.constant 8 : index
    %c0_8 = arith.constant 0 : index
    %13 = vector.load %arg9[%c8, %c0_8] : memref<72x256xf32, #tpu.memory_space<vmem>>, vector<8x256xf32>
    tpu.vector_store %arg9[%c8, %c0_8], %12 {strides = array<i32>} : memref<72x256xf32, #tpu.memory_space<vmem>>, vector<8x256xf32>,
    %c15_i32 = arith.constant 15 : i32
    %14 = tpu.dynamic_rotate %2 by %c15_i32 dim 1 : vector<8x256xf32>, i32 -> vector<8x256xf32>
    %15 = vector.extract_strided_slice %0 {offsets = [2, 0], sizes = [1, 256], strides = [1, 1]} : vector<9x256xf32> to vector<1x256xf32>
    %16 = vector.broadcast %15 : vector<1x256xf32> to vector<8x256xf32>
    %17 = arith.mulf %14, %16 : vector<8x256xf32>
    %c16 = arith.constant 16 : index
    %c0_9 = arith.constant 0 : index
    %18 = vector.load %arg9[%c16, %c0_9] : memref<72x256xf32, #tpu.memory_space<vmem>>, vector<8x256xf32>
    tpu.vector_store %arg9[%c16, %c0_9], %17 {strides = array<i32>} : memref<72x256xf32, #tpu.memory_space<vmem>>, vector<8x256xf32>,
    %c1_i32 = arith.constant 1 : i32
    %19 = tpu.dynamic_rotate %2 by %c1_i32 dim 1 : vector<8x256xf32>, i32 -> vector<8x256xf32>
    %20 = vector.extract_strided_slice %0 {offsets = [3, 0], sizes = [1, 256], strides = [1, 1]} : vector<9x256xf32> to vector<1x256xf32>
    %21 = vector.broadcast %20 : vector<1x256xf32> to vector<8x256xf32>
    %22 = arith.mulf %19, %21 : vector<8x256xf32>
    %c24 = arith.constant 24 : index
    %c0_10 = arith.constant 0 : index
    %23 = vector.load %arg9[%c24, %c0_10] : memref<72x256xf32, #tpu.memory_space<vmem>>, vector<8x256xf32>
    tpu.vector_store %arg9[%c24, %c0_10], %22 {strides = array<i32>} : memref<72x256xf32, #tpu.memory_space<vmem>>, vector<8x256xf32>,
    %c32 = arith.constant 32 : index
    %c0_11 = arith.constant 0 : index
    %24 = vector.load %arg9[%c32, %c0_11] : memref<72x256xf32, #tpu.memory_space<vmem>>, vector<8x256xf32>
    tpu.vector_store %arg9[%c32, %c0_11], %2 {strides = array<i32>} : memref<72x256xf32, #tpu.memory_space<vmem>>, vector<8x256xf32>,
    %c255_i32 = arith.constant 255 : i32
    %25 = tpu.dynamic_rotate %2 by %c255_i32 dim 1 : vector<8x256xf32>, i32 -> vector<8x256xf32>
    %26 = vector.extract_strided_slice %0 {offsets = [5, 0], sizes = [1, 256], strides = [1, 1]} : vector<9x256xf32> to vector<1x256xf32>
    %27 = vector.broadcast %26 : vector<1x256xf32> to vector<8x256xf32>
    %28 = arith.mulf %25, %27 : vector<8x256xf32>
    %c40 = arith.constant 40 : index
    %c0_12 = arith.constant 0 : index
    %29 = vector.load %arg9[%c40, %c0_12] : memref<72x256xf32, #tpu.memory_space<vmem>>, vector<8x256xf32>
    tpu.vector_store %arg9[%c40, %c0_12], %28 {strides = array<i32>} : memref<72x256xf32, #tpu.memory_space<vmem>>, vector<8x256xf32>,
    %c241_i32 = arith.constant 241 : i32
    %30 = tpu.dynamic_rotate %2 by %c241_i32 dim 1 : vector<8x256xf32>, i32 -> vector<8x256xf32>
    %31 = vector.extract_strided_slice %0 {offsets = [6, 0], sizes = [1, 256], strides = [1, 1]} : vector<9x256xf32> to vector<1x256xf32>
    %32 = vector.broadcast %31 : vector<1x256xf32> to vector<8x256xf32>
    %33 = arith.mulf %30, %32 : vector<8x256xf32>
    %c48 = arith.constant 48 : index
    %c0_13 = arith.constant 0 : index
    %34 = vector.load %arg9[%c48, %c0_13] : memref<72x256xf32, #tpu.memory_space<vmem>>, vector<8x256xf32>
    tpu.vector_store %arg9[%c48, %c0_13], %33 {strides = array<i32>} : memref<72x256xf32, #tpu.memory_space<vmem>>, vector<8x256xf32>,
    %c240_i32 = arith.constant 240 : i32
    %35 = tpu.dynamic_rotate %2 by %c240_i32 dim 1 : vector<8x256xf32>, i32 -> vector<8x256xf32>
    %36 = vector.extract_strided_slice %0 {offsets = [7, 0], sizes = [1, 256], strides = [1, 1]} : vector<9x256xf32> to vector<1x256xf32>
    %37 = vector.broadcast %36 : vector<1x256xf32> to vector<8x256xf32>
    %38 = arith.mulf %35, %37 : vector<8x256xf32>
    %c56 = arith.constant 56 : index
    %c0_14 = arith.constant 0 : index
    %39 = vector.load %arg9[%c56, %c0_14] : memref<72x256xf32, #tpu.memory_space<vmem>>, vector<8x256xf32>
    tpu.vector_store %arg9[%c56, %c0_14], %38 {strides = array<i32>} : memref<72x256xf32, #tpu.memory_space<vmem>>, vector<8x256xf32>,
    %c239_i32 = arith.constant 239 : i32
    %40 = tpu.dynamic_rotate %2 by %c239_i32 dim 1 : vector<8x256xf32>, i32 -> vector<8x256xf32>
    %41 = vector.extract_strided_slice %0 {offsets = [8, 0], sizes = [1, 256], strides = [1, 1]} : vector<9x256xf32> to vector<1x256xf32>
    %42 = vector.broadcast %41 : vector<1x256xf32> to vector<8x256xf32>
    %43 = arith.mulf %40, %42 : vector<8x256xf32>
    %c64 = arith.constant 64 : index
    %c0_15 = arith.constant 0 : index
    %44 = vector.load %arg9[%c64, %c0_15] : memref<72x256xf32, #tpu.memory_space<vmem>>, vector<8x256xf32>
    tpu.vector_store %arg9[%c64, %c0_15], %43 {strides = array<i32>} : memref<72x256xf32, #tpu.memory_space<vmem>>, vector<8x256xf32>,
    %c0_16 = arith.constant 0 : index
    %c0_17 = arith.constant 0 : index
    %45 = vector.load %arg3[%c0_16, %c0_17] : memref<8x72xf32, #tpu.memory_space<vmem>>, vector<8x72xf32>
    %c0_18 = arith.constant 0 : index
    %c0_19 = arith.constant 0 : index
    %46 = vector.load %arg9[%c0_18, %c0_19] : memref<72x256xf32, #tpu.memory_space<vmem>>, vector<72x256xf32>
    %cst = arith.constant dense<0.000000e+00> : vector<8x256xf32>
    %47 = tpu.matmul %45, %46, %cst {dimension_numbers = #tpu.dot_dimension_numbers<[1], [0], [0], [1], [0, 0, 1, 1], [], []>} : vector<8x72xf32>, vector<72x256xf32>, vector<8x256xf32> -> vector<8x256xf32>
    %48 = vector.broadcast %3 : vector<8x1xf32> to vector<8x256xf32>
    %49 = arith.addf %47, %48 : vector<8x256xf32>
    %cst_20 = arith.constant 0.000000e+00 : f32
    %50 = vector.broadcast %cst_20 : f32 to vector<8x256xf32>
    %51 = arith.maximumf %49, %50 : vector<8x256xf32>
    %c0_21 = arith.constant 0 : index
    %c0_22 = arith.constant 0 : index
    %c0_23 = arith.constant 0 : index
    %52 = vector.load %arg7[%c0_21, %c0_22, %c0_23] : memref<1x8x256xf32, #tpu.memory_space<vmem>>, vector<1x8x256xf32>
    %53 = vector.shape_cast %52 : vector<1x8x256xf32> to vector<8x256xf32>
    %54 = vector.shape_cast %51 : vector<8x256xf32> to vector<1x8x256xf32>
    tpu.vector_store %arg7[%c0_21, %c0_22, %c0_23], %54 {strides = array<i32>} : memref<1x8x256xf32, #tpu.memory_space<vmem>>, vector<1x8x256xf32>,
    %c0_24 = arith.constant 0 : index
    %c0_25 = arith.constant 0 : index
    %55 = vector.load %arg6[%c0_24, %c0_25] : memref<16x1xf32, #tpu.memory_space<vmem>>, vector<16x1xf32>
    %c17_i32_26 = arith.constant 17 : i32
    %56 = tpu.dynamic_rotate %51 by %c17_i32_26 dim 1 : vector<8x256xf32>, i32 -> vector<8x256xf32>
    %57 = vector.extract_strided_slice %0 {offsets = [0, 0], sizes = [1, 256], strides = [1, 1]} : vector<9x256xf32> to vector<1x256xf32>
    %58 = vector.broadcast %57 : vector<1x256xf32> to vector<8x256xf32>
    %59 = arith.mulf %56, %58 : vector<8x256xf32>
    %c0_27 = arith.constant 0 : index
    %c0_28 = arith.constant 0 : index
    %60 = vector.load %arg10[%c0_27, %c0_28] : memref<72x256xf32, #tpu.memory_space<vmem>>, vector<8x256xf32>
    tpu.vector_store %arg10[%c0_27, %c0_28], %59 {strides = array<i32>} : memref<72x256xf32, #tpu.memory_space<vmem>>, vector<8x256xf32>,
    %c16_i32_29 = arith.constant 16 : i32
    %61 = tpu.dynamic_rotate %51 by %c16_i32_29 dim 1 : vector<8x256xf32>, i32 -> vector<8x256xf32>
    %62 = vector.extract_strided_slice %0 {offsets = [1, 0], sizes = [1, 256], strides = [1, 1]} : vector<9x256xf32> to vector<1x256xf32>
    %63 = vector.broadcast %62 : vector<1x256xf32> to vector<8x256xf32>
    %64 = arith.mulf %61, %63 : vector<8x256xf32>
    %c8_30 = arith.constant 8 : index
    %c0_31 = arith.constant 0 : index
    %65 = vector.load %arg10[%c8_30, %c0_31] : memref<72x256xf32, #tpu.memory_space<vmem>>, vector<8x256xf32>
    tpu.vector_store %arg10[%c8_30, %c0_31], %64 {strides = array<i32>} : memref<72x256xf32, #tpu.memory_space<vmem>>, vector<8x256xf32>,
    %c15_i32_32 = arith.constant 15 : i32
    %66 = tpu.dynamic_rotate %51 by %c15_i32_32 dim 1 : vector<8x256xf32>, i32 -> vector<8x256xf32>
    %67 = vector.extract_strided_slice %0 {offsets = [2, 0], sizes = [1, 256], strides = [1, 1]} : vector<9x256xf32> to vector<1x256xf32>
    %68 = vector.broadcast %67 : vector<1x256xf32> to vector<8x256xf32>
    %69 = arith.mulf %66, %68 : vector<8x256xf32>
    %c16_33 = arith.constant 16 : index
    %c0_34 = arith.constant 0 : index
    %70 = vector.load %arg10[%c16_33, %c0_34] : memref<72x256xf32, #tpu.memory_space<vmem>>, vector<8x256xf32>
    tpu.vector_store %arg10[%c16_33, %c0_34], %69 {strides = array<i32>} : memref<72x256xf32, #tpu.memory_space<vmem>>, vector<8x256xf32>,
    %c1_i32_35 = arith.constant 1 : i32
    %71 = tpu.dynamic_rotate %51 by %c1_i32_35 dim 1 : vector<8x256xf32>, i32 -> vector<8x256xf32>
    %72 = vector.extract_strided_slice %0 {offsets = [3, 0], sizes = [1, 256], strides = [1, 1]} : vector<9x256xf32> to vector<1x256xf32>
    %73 = vector.broadcast %72 : vector<1x256xf32> to vector<8x256xf32>
    %74 = arith.mulf %71, %73 : vector<8x256xf32>
    %c24_36 = arith.constant 24 : index
    %c0_37 = arith.constant 0 : index
    %75 = vector.load %arg10[%c24_36, %c0_37] : memref<72x256xf32, #tpu.memory_space<vmem>>, vector<8x256xf32>
    tpu.vector_store %arg10[%c24_36, %c0_37], %74 {strides = array<i32>} : memref<72x256xf32, #tpu.memory_space<vmem>>, vector<8x256xf32>,
    %c32_38 = arith.constant 32 : index
    %c0_39 = arith.constant 0 : index
    %76 = vector.load %arg10[%c32_38, %c0_39] : memref<72x256xf32, #tpu.memory_space<vmem>>, vector<8x256xf32>
    tpu.vector_store %arg10[%c32_38, %c0_39], %51 {strides = array<i32>} : memref<72x256xf32, #tpu.memory_space<vmem>>, vector<8x256xf32>,
    %c255_i32_40 = arith.constant 255 : i32
    %77 = tpu.dynamic_rotate %51 by %c255_i32_40 dim 1 : vector<8x256xf32>, i32 -> vector<8x256xf32>
    %78 = vector.extract_strided_slice %0 {offsets = [5, 0], sizes = [1, 256], strides = [1, 1]} : vector<9x256xf32> to vector<1x256xf32>
    %79 = vector.broadcast %78 : vector<1x256xf32> to vector<8x256xf32>
    %80 = arith.mulf %77, %79 : vector<8x256xf32>
    %c40_41 = arith.constant 40 : index
    %c0_42 = arith.constant 0 : index
    %81 = vector.load %arg10[%c40_41, %c0_42] : memref<72x256xf32, #tpu.memory_space<vmem>>, vector<8x256xf32>
    tpu.vector_store %arg10[%c40_41, %c0_42], %80 {strides = array<i32>} : memref<72x256xf32, #tpu.memory_space<vmem>>, vector<8x256xf32>,
    %c241_i32_43 = arith.constant 241 : i32
    %82 = tpu.dynamic_rotate %51 by %c241_i32_43 dim 1 : vector<8x256xf32>, i32 -> vector<8x256xf32>
    %83 = vector.extract_strided_slice %0 {offsets = [6, 0], sizes = [1, 256], strides = [1, 1]} : vector<9x256xf32> to vector<1x256xf32>
    %84 = vector.broadcast %83 : vector<1x256xf32> to vector<8x256xf32>
    %85 = arith.mulf %82, %84 : vector<8x256xf32>
    %c48_44 = arith.constant 48 : index
    %c0_45 = arith.constant 0 : index
    %86 = vector.load %arg10[%c48_44, %c0_45] : memref<72x256xf32, #tpu.memory_space<vmem>>, vector<8x256xf32>
    tpu.vector_store %arg10[%c48_44, %c0_45], %85 {strides = array<i32>} : memref<72x256xf32, #tpu.memory_space<vmem>>, vector<8x256xf32>,
    %c240_i32_46 = arith.constant 240 : i32
    %87 = tpu.dynamic_rotate %51 by %c240_i32_46 dim 1 : vector<8x256xf32>, i32 -> vector<8x256xf32>
    %88 = vector.extract_strided_slice %0 {offsets = [7, 0], sizes = [1, 256], strides = [1, 1]} : vector<9x256xf32> to vector<1x256xf32>
    %89 = vector.broadcast %88 : vector<1x256xf32> to vector<8x256xf32>
    %90 = arith.mulf %87, %89 : vector<8x256xf32>
    %c56_47 = arith.constant 56 : index
    %c0_48 = arith.constant 0 : index
    %91 = vector.load %arg10[%c56_47, %c0_48] : memref<72x256xf32, #tpu.memory_space<vmem>>, vector<8x256xf32>
    tpu.vector_store %arg10[%c56_47, %c0_48], %90 {strides = array<i32>} : memref<72x256xf32, #tpu.memory_space<vmem>>, vector<8x256xf32>,
    %c239_i32_49 = arith.constant 239 : i32
    %92 = tpu.dynamic_rotate %51 by %c239_i32_49 dim 1 : vector<8x256xf32>, i32 -> vector<8x256xf32>
    %93 = vector.extract_strided_slice %0 {offsets = [8, 0], sizes = [1, 256], strides = [1, 1]} : vector<9x256xf32> to vector<1x256xf32>
    %94 = vector.broadcast %93 : vector<1x256xf32> to vector<8x256xf32>
    %95 = arith.mulf %92, %94 : vector<8x256xf32>
    %c64_50 = arith.constant 64 : index
    %c0_51 = arith.constant 0 : index
    %96 = vector.load %arg10[%c64_50, %c0_51] : memref<72x256xf32, #tpu.memory_space<vmem>>, vector<8x256xf32>
    tpu.vector_store %arg10[%c64_50, %c0_51], %95 {strides = array<i32>} : memref<72x256xf32, #tpu.memory_space<vmem>>, vector<8x256xf32>,
    %c0_52 = arith.constant 0 : index
    %c0_53 = arith.constant 0 : index
    %97 = vector.load %arg5[%c0_52, %c0_53] : memref<16x72xf32, #tpu.memory_space<vmem>>, vector<16x72xf32>
    %c0_54 = arith.constant 0 : index
    %c0_55 = arith.constant 0 : index
    %98 = vector.load %arg10[%c0_54, %c0_55] : memref<72x256xf32, #tpu.memory_space<vmem>>, vector<72x256xf32>
    %cst_56 = arith.constant dense<0.000000e+00> : vector<16x256xf32>
    %99 = tpu.matmul %97, %98, %cst_56 {dimension_numbers = #tpu.dot_dimension_numbers<[1], [0], [0], [1], [0, 0, 1, 1], [], []>} : vector<16x72xf32>, vector<72x256xf32>, vector<16x256xf32> -> vector<16x256xf32>
    %100 = vector.broadcast %55 : vector<16x1xf32> to vector<16x256xf32>
    %101 = arith.addf %99, %100 : vector<16x256xf32>
    %cst_57 = arith.constant 0.000000e+00 : f32
    %102 = vector.broadcast %cst_57 : f32 to vector<16x256xf32>
    %103 = arith.maximumf %101, %102 : vector<16x256xf32>
    %c0_58 = arith.constant 0 : index
    %c0_59 = arith.constant 0 : index
    %c0_60 = arith.constant 0 : index
    %104 = vector.load %arg8[%c0_58, %c0_59, %c0_60] : memref<1x16x256xf32, #tpu.memory_space<vmem>>, vector<1x16x256xf32>
    %105 = vector.shape_cast %104 : vector<1x16x256xf32> to vector<16x256xf32>
    %106 = vector.shape_cast %103 : vector<16x256xf32> to vector<1x16x256xf32>
    tpu.vector_store %arg8[%c0_58, %c0_59, %c0_60], %106 {strides = array<i32>} : memref<1x16x256xf32, #tpu.memory_space<vmem>>, vector<1x16x256xf32>,
    return
  }
  func.func @transform_0(%arg0: i32) -> (i32, i32, i32) {
    %c0_i32 = arith.constant 0 : i32
    %c0_i32_0 = arith.constant 0 : i32
    %c0_i32_1 = arith.constant 0 : i32
    return %arg0, %c0_i32, %c0_i32_0 : i32, i32, i32
  }
  func.func @transform_1(%arg0: i32) -> (i32, i32) {
    %c0_i32 = arith.constant 0 : i32
    %c0_i32_0 = arith.constant 0 : i32
    %c0_i32_1 = arith.constant 0 : i32
    return %c0_i32, %c0_i32_0 : i32, i32
  }
  func.func @transform_2(%arg0: i32) -> (i32, i32) {
    %c0_i32 = arith.constant 0 : i32
    %c0_i32_0 = arith.constant 0 : i32
    %c0_i32_1 = arith.constant 0 : i32
    return %c0_i32, %c0_i32_0 : i32, i32
  }
  func.func @transform_3(%arg0: i32) -> (i32, i32) {
    %c0_i32 = arith.constant 0 : i32
    %c0_i32_0 = arith.constant 0 : i32
    %c0_i32_1 = arith.constant 0 : i32
    return %c0_i32, %c0_i32_0 : i32, i32
  }
  func.func @transform_4(%arg0: i32) -> (i32, i32) {
    %c0_i32 = arith.constant 0 : i32
    %c0_i32_0 = arith.constant 0 : i32
    %c0_i32_1 = arith.constant 0 : i32
    return %c0_i32, %c0_i32_0 : i32, i32
  }
  func.func @transform_5(%arg0: i32) -> (i32, i32) {
    %c0_i32 = arith.constant 0 : i32
    %c0_i32_0 = arith.constant 0 : i32
    %c0_i32_1 = arith.constant 0 : i32
    return %c0_i32, %c0_i32_0 : i32, i32
  }
  func.func @transform_6(%arg0: i32) -> (i32, i32, i32) {
    %c0_i32 = arith.constant 0 : i32
    %c0_i32_0 = arith.constant 0 : i32
    %c0_i32_1 = arith.constant 0 : i32
    return %arg0, %c0_i32, %c0_i32_0 : i32, i32, i32
  }
  func.func @transform_7(%arg0: i32) -> (i32, i32, i32) {
    %c0_i32 = arith.constant 0 : i32
    %c0_i32_0 = arith.constant 0 : i32
    %c0_i32_1 = arith.constant 0 : i32
    return %arg0, %c0_i32, %c0_i32_0 : i32, i32, i32
  }
}

</mosaic_0001>

<bundles_post_ra>
// kernel: tpu_custom_call.1
= control target key start
LH: loop header
LB: loop body
LE: loop exit
PB: predicated region body
PF: predicated region fallthrough
CT: control target
= control target key end

     0   :  { %13 = vsyncpa [#allocation5], 0  ;;  %s1796_s0 = inlined_call_operand.hbm [shape: f32[2,8,256], index: 0, kind: input, shape index: {}]   ;;  %s1797_s1 = inlined_call_operand.hbm [shape: f32[9,256], index: 1, kind: input, shape index: {}]   ;;  %s1798_s2 = inlined_call_operand.vmem [shape: f32[8,72], index: 2, kind: input, shape index: {}]   ;;  %s1799_s3 = inlined_call_operand.vmem [shape: f32[8,1], index: 3, kind: input, shape index: {}]   ;;  %s1800_s4 = inlined_call_operand.vmem [shape: f32[16,72], index: 4, kind: input, shape index: {}]   ;;  %s1801_s5 = inlined_call_operand.vmem [shape: f32[16,1], index: 5, kind: input, shape index: {}]   ;;  %s1802_s6 = inlined_call_operand.hbm [shape: f32[2,8,256], index: 6, kind: output, shape index: {0}]   ;;  %s1803_s7 = inlined_call_operand.hbm [shape: f32[2,16,256], index: 7, kind: output, shape index: {1}]  }
   0x1   :  { %15 = vsyncpa [#allocation5 + $0x1], 0 }
   0x2   :  { %16 = vsyncpa [#allocation8], 0 }
   0x3   :  { %17 = vsyncpa [#allocation6], 0 }
   0x4   :  { %19 = vsyncpa [#allocation6 + $0x1], 0 }
   0x5   :  { %20 = vsyncpa [#allocation11], 0 }
   0x6   :  { %22 = vsyncpa [#allocation11 + $0x1], 0  ;;  %s1296_s24 = smov 0   ;;  %s1298_s25 = smov 0  }
   0x7   :  { %s1300_s26 = smov 0   ;;  %s1302_s27 = smov 0  }
   0x8 LB: > { %s1317_s28 = sadd.s32 4294967295, %s1237_s27   ;;  %s940_s29 = sadd.s32 4294967294, %s1237_s27   ;;  %s1237_s27 = sphi %s1302_s27, %s1823_s27   ;;  %s1233_s26 = sphi %s1300_s26, %s1822_s26   ;;  %s1229_s25 = sphi %s1298_s25, %s1821_s25   ;;  %s1225_s24 = sphi %s1296_s24, %s1820_s24  }
   0x9   : > { %p48_p0 = scmp.ne.s32.totalorder %s1229_s25, %s1225_s24  ;;  %p1804_p1 = scmp.eq.s32.totalorder %s1317_s28, 0 }
   0xa   : > { %p183_p3 = scmp.eq.s32.totalorder %s940_s29, 1  ;;  %p941_p5 = scmp.ge.s32.totalorder %s1237_s27, 1 }
   0xb   : > { %p1326_p4 = por %p1804_p1, %p48_p0  ;;  %p216_p7 = scmp.lt.s32.totalorder %s1237_s27, 3 }
   0xc   : > { %p1331_p6 = por %p183_p3, %p48_p0  ;;  %s1239_s10 = smov [#allocation7]  }
   0xd   : > { %s1807_s30 = scalar_select %p1326_p4, 1, 0 }
   0xe   : > { %s1808_s8 = scalar_select %p1331_p6, 1, 0 }
   0xf   : > { %p1336_p8 = pnand %p941_p5, %p216_p7  ;;  %s228_s11 = sshll.u32 %s1239_s10, 4  ;;  %s1340_s11 = int_to_ptr.vmem [resolvable:$true] %s228_s11 }
  0x10   : > { %s1352_s13 = sadd.s32 1, %s1237_s27   ;;  %s35_s14 = sadd.s32 1, %s1233_s26 }
  0x11   : > { %s1809_s9 = scalar_select %p1336_p8, 1, 0 }
  0x12   : > { %p1010_p9 = pneg %p1336_p8  ;;  %s32_s15 = ssub.s32 %s1237_s27, %s1352_s13 }
  0x13   : > { %s1077_s18 = scalar_lea.hbm %s1797_s1, 512 }
  0x14   : > { %p1347_p11 = pnand %p1010_p9, %p1804_p1  ;;  %p1078_p12 = scmp.ne.s32.totalorder %s1797_s1, %s1077_s18 }
  0x15   : > { %p1084_p5 = scmp.lt.u32.totalorder %s1077_s18, %s1797_s1 }
  0x16   : > { %p1079_p13 = pneg %p1347_p11 }
  0x18   : > { %p1080_p0 = pnand %p1079_p13, %p1078_p12 }
  0x1a   : > { %p1081_p3 = pneg %p1080_p0 }
  0x1c   : > { %p1086_p7 = pnand %p1084_p5, %p1081_p3 }
  0x1e   : > { %1089 = shalt.err (!%p1086_p7)
}
  0x1f   : > { %s1090_s23 = scalar_lea.vmem %s1340_s11, 512  ;;  %p1098_p2 = scmp.lt.s32.totalorder %s1340_s11, %s1340_s11 }
  0x20   : > { %p1091_p9 = scmp.ne.s32.totalorder %s1340_s11, %s1090_s23  ;;  %p1099_p6 = scmp.lt.s32.totalorder %s1090_s23, %s1090_s23 }
  0x22   : > { %p1093_p10 = pnand %p1091_p9, %p1079_p13  ;;  %p1100_p4 = por %p1099_p6, %p1098_p2 }
  0x24   : > { %p1094_p1 = pneg %p1093_p10 }
  0x26   : > { %p1101_p8 = pnand %p1100_p4, %p1094_p1 }
  0x28   : > { %1104 = shalt.err (!%p1101_p8)
}
  0x29   : > { %s1240_s29 = smov 256   ;;  %s1241_s10 = smov 16  }
  0x2a   : > { %1013 = dma.hbm_to_vmem [thread:$0]  (!%p1347_p11), %s1797_s1, 512, %s1340_s11, [#allocation8], %s1240_s29, %s1240_s29, %s1241_s10  }
  0x2b   : > { %p33_p2 = scmp.eq.s32.totalorder %s32_s15, 0  ;;  %p42_p1 = scmp.ne.s32.totalorder %s1233_s26, %s1229_s25 }
  0x2c   : > { %p43_p4 = scmp.eq.s32.totalorder %s1237_s27, 0  ;;  %p1026_p6 = scmp.lt.s32.totalorder %s1237_s27, 2 }
  0x2d   : > { %s1383_s18 = scalar_select %p33_p2, %s1233_s26, %s35_s14  }
  0x2e   : > { %p44_p8 = por %p43_p4, %p42_p1  ;;  %p1811_p10 = scmp.eq.s32.totalorder %s1317_s28, 1 }
  0x2f   : > { %s254_s20 = sand.u32 1, %s1233_s26   ;;  %s965_s21 = sshll.u32 %s1237_s27, 8 }
  0x30   : > { %p1387_p12 = por %p1811_p10, %p42_p1  ;;  %s944_s22 = sshll.u32 %s254_s20, 4 }
  0x31   : > { %s1396_s16 = scalar_lea.hbm %s1796_s0, %s965_s21  ;;  %s258_s11 = scalar_lea.vmem [#allocation4], %s944_s22 }
  0x32   : > { %s266_s14 = sshll.u32 %s258_s11, 4  ;;  %p1398_p11 = pnand %p1026_p6, %p44_p8  ;;  %s1402_s14 = int_to_ptr.vmem [resolvable:$true] %s266_s14 }
  0x33   : > { %s255_s29 = scalar_lea.sflag [#allocation5], %s254_s20  ;;  %s1105_s10 = scalar_lea.hbm %s1396_s16, 256 }
  0x34   : > { %p1106_p13 = scmp.ne.s32.totalorder %s1396_s16, %s1105_s10  ;;  %p1107_p0 = pneg %p1398_p11 }
  0x35   : > { %s1110_s22 = scalar_lea.hbm %s1796_s0, 512  ;;  %p1111_p7 = scmp.lt.u32.totalorder %s1396_s16, %s1796_s0 }
  0x36   : > { %p1108_p3 = pnand %p1107_p0, %p1106_p13  ;;  %p1112_p9 = scmp.lt.u32.totalorder %s1110_s22, %s1105_s10 }
  0x37   : > { %p1114_p1 = scmp.lt.u32.totalorder %s1105_s10, %s1396_s16 }
  0x38   : > { %p1109_p5 = pneg %p1108_p3  ;;  %p1113_p2 = por %p1112_p9, %p1111_p7 }
  0x3a   : > { %p1115_p4 = por %p1114_p1, %p1113_p2 }
  0x3c   : > { %p1116_p6 = pnand %p1115_p4, %p1109_p5 }
  0x3e   : > { %1119 = shalt.err (!%p1116_p6)
}
  0x3f   : > { %s1120_s20 = scalar_lea.vmem %s1402_s14, 256  ;;  %s1242_s11 = smov [#allocation4]  }
  0x40   : > { %p1121_p8 = scmp.ne.s32.totalorder %s1402_s14, %s1120_s20  ;;  %s1125_s17 = sshll.u32 %s1242_s11, 4  ;;  %s1126_s17 = int_to_ptr.vmem [resolvable:$false] %s1125_s17 }
  0x41   : > { %s1127_s21 = scalar_lea.vmem %s1126_s17, 512  ;;  %p1128_p3 = scmp.lt.s32.totalorder %s1402_s14, %s1126_s17 }
  0x42   : > { %p1123_p10 = pnand %p1121_p8, %p1107_p0  ;;  %p1129_p7 = scmp.lt.s32.totalorder %s1127_s21, %s1120_s20 }
  0x44   : > { %p1124_p13 = pneg %p1123_p10  ;;  %p1130_p9 = por %p1129_p7, %p1128_p3 }
  0x46   : > { %p1131_p2 = pnand %p1130_p9, %p1124_p13 }
  0x48   : > { %1134 = shalt.err (!%p1131_p2)
}
  0x49   : > { %1017 = dma.hbm_to_vmem [thread:$0]  (!%p1398_p11), %s1396_s16, 256, %s1402_s14, %s255_s29  }
  0x4a   : > { %p1814_p5 = scmp.ne.s32.totalorder %s1809_s9, 0 }
  0x4b   : > { %s1432_s10 = sand.u32 (!%p1814_p5), 1, %s1229_s25   ;;  %p1815_p0 = scmp.ne.s32.totalorder (!%p1814_p5), %s1807_s30, 0 }
  0x4c   : > { %275 = sbr.rel (%p1814_p5) target bundleno = 844 (0x34c), region = 44  ;;  %s948_s22 = sshll.u32 (!%p1814_p5), %s1432_s10, 4 }
  0x4d   : > { %s278_s12 = scalar_lea.sflag (!%p1814_p5), [#allocation5], %s1432_s10  ;;  %s281_s23 = scalar_lea.vmem (!%p1814_p5), [#allocation4], %s948_s22 }
  0x53   : > { %1208 = dma.done.wait (%p1815_p0), %s278_s12, 256  }
  0x54   : > { %1210 = vsyncadd (%p1815_p0), %s278_s12, 4294967040  ;;  %p1816_p11 = scmp.eq.s32.totalorder %s1317_s28, 0 }
  0x56   : > { %1212 = dma.done.wait (%p1816_p11), [#allocation8], 512   ;;  %p1817_p1 = pmov %p1816_p11 }
  0x57   : > { %v1446_v0 = vld [vmem:[%s281_s23] sm:$0xff]  ;;  %s1243_s9 = smov 16   ;;  %s1244_s16 = smov 17   ;;  %v1452_v1 = vld [vmem:[%s281_s23 + $0x8] sm:$0xff]  ;;  %v1249_v2 = vmov 0.0   ;;  %v1250_v3 = vmov 0   ;;  %v332_v5 = vlaneseq }
  0x58   : > { %1214 = vsyncadd (%p1817_p1), [#allocation8], 4294966784  ;;  %349 = vrot.lane.b32.xlu1 %v1446_v0, %s1243_s9  ;;  %328 = vrot.lane.b32.xlu0 %v1446_v0, %s1244_s16  ;;  %s1245_s30 = smov 15   ;;  %s1246_s14 = smov 1   ;;  %v327_v4 = vld [vmem:[%s1799_s3] sm:$0xff]  ;;  %v1495_v11 = vld [vmem:[#allocation7 + $0x8] sm:$0xff] }
  0x59   : > { %s1247_s15 = smov 127   ;;  %s1248_s29 = smov 113   ;;  %576 = vmatprep.mubr.f32.mxu0 %v1249_v2  ;;  %771 = vmatprep.mubr.f32.mxu1 %v1249_v2  ;;  %v1487_v6 = vshrl.u32 %v332_v5, 7  ;;  %v1489_v7 = vand.u32 127, %v332_v5  ;;  %v1493_v10 = vld [vmem:[#allocation7] sm:$0xff]  ;;  %vm508_vm8 = vcmask 588800  }
  0x5a   : > { %1075 = vset.pattern.permute.xlu0 %v1250_v3  ;;  %1076 = vset.pattern.permute.xlu1 %v1250_v3  ;;  %s1251_s20 = smov 112   ;;  %s1252_s11 = smov 111  }
  0x5b   : > { %v358_v8 = vsub.s32 1, %v1487_v6  ;;  %v339_v9 = vsub.s32 0, %v1487_v6  ;;  %vm353_vm0 = vcmp.lt.s32.totalorder %v1489_v7, 16  ;;  %vm334_vm1 = vcmp.lt.s32.totalorder %v1489_v7, 17  ;;  %s1620_s17 = scalar_lea.vmem [#allocation9], %s948_s22  ;;  %s966_s21 = sshll.u32 %s1317_s28, 8 }
  0x5c   : > { %351 = vrot.lane.b32.xlu1 %v1452_v1, %s1243_s9  ;;  %330 = vrot.lane.b32.xlu0 %v1452_v1, %s1244_s16  ;;  %v377_v20 = vsub.s32 2, %v1487_v6  ;;  %v396_v21 = vsub.s32 3, %v1487_v6  ;;  %vm372_vm2 = vcmp.lt.s32.totalorder %v1489_v7, 15  ;;  %vm391_vm3 = vcmp.lt.s32.totalorder %v1489_v7, 1  ;;  %s812_s12 = sshll.u32 %s1620_s17, 4  ;;  %s813_s12 = int_to_ptr.vmem [resolvable:$true] %s812_s12 }
  0x5d   : > { %v1500_v14 = vrot.slane %v1493_v10, %v358_v8  ;;  %v1503_v15 = vrot.slane %v1493_v10, %v339_v9  ;;  %v1506_v16 = vrot.slane %v1495_v11, %v339_v9  ;;  %v1509_v17 = vrot.slane %v1495_v11, %v358_v8 }
  0x5e   : > { %v417_v34 = vsub.s32 5, %v1487_v6  ;;  %v1529_v35 = vrot.slane %v1493_v10, %v377_v20  ;;  %v1532_v36 = vrot.slane %v1495_v11, %v377_v20  ;;  %v1535_v37 = vrot.slane %v1493_v10, %v396_v21 }
  0x5f   : > { %v1538_v38 = vrot.slane %v1495_v11, %v396_v21  ;;  %vm412_vm4 = vcmp.lt.s32.totalorder %v1489_v7, 127  ;;  %v436_v57 = vsub.s32 6, %v1487_v6  ;;  %v455_v60 = vsub.s32 7, %v1487_v6  ;;  %v1596_v21 = vld [vmem:[#allocation7 + $0x18] ss:$0 sm:$0xff] }
  0x60   : > { %370 = vrot.lane.b32.xlu1 %v1452_v1, %s1245_s30  ;;  %368 = vrot.lane.b32.xlu0 %v1446_v0, %s1245_s30  ;;  %v1550_v45 = vrot.slane %v1493_v10, %v417_v34  ;;  %v1553_v46 = vrot.slane %v1495_v11, %v417_v34  ;;  %vm431_vm5 = vcmp.lt.s32.totalorder %v1489_v7, 113  ;;  %vm450_vm6 = vcmp.lt.s32.totalorder %v1489_v7, 112 }
  0x61   : > { %v1574_v5 = vrot.slane %v1495_v11, %v436_v57  ;;  %v1578_v6 = vrot.slane %v1493_v10, %v455_v60  ;;  %v1581_v8 = vrot.slane %v1495_v11, %v455_v60  ;;  %vm469_vm7 = vcmp.lt.s32.totalorder %v1489_v7, 111  ;;  %v672_v7 = vld [vmem:[%s1800_s4 + $0x8] sm:$0xff] }
  0x64   : > { %389 = vrot.lane.b32.xlu1 %v1452_v1, %s1246_s14  ;;  %387 = vrot.lane.b32.xlu0 %v1446_v0, %s1246_s14 }
  0x68   : > { %410 = vrot.lane.b32.xlu1 %v1452_v1, %s1247_s15  ;;  %408 = vrot.lane.b32.xlu0 %v1446_v0, %s1247_s15 }
  0x6c   : > { %429 = vrot.lane.b32.xlu1 %v1452_v1, %s1248_s29  ;;  %427 = vrot.lane.b32.xlu0 %v1446_v0, %s1248_s29 }
  0x70   : > { %448 = vrot.lane.b32.xlu1 %v1452_v1, %s1251_s20  ;;  %446 = vrot.lane.b32.xlu0 %v1446_v0, %s1251_s20 }
  0x74   : > { %467 = vrot.lane.b32.xlu1 %v1452_v1, %s1252_s11  ;;  %465 = vrot.lane.b32.xlu0 %v1446_v0, %s1252_s11 }
  0x78   : > { %505 = vperm.xlu0 %1075, %v327_v4   ;;  %v1571_v4 = vrot.slane %v1493_v10, %v436_v57 }
  0xca   : > { %v350_v12 = vpop.permute.xlu1 %349  ;;  %v329_v13 = vpop.permute.xlu0 %328 }
  0xce   : > { %v352_v18 = vpop.permute.xlu1 %351  ;;  %v331_v19 = vpop.permute.xlu0 %330 }
  0xcf   : > { %v354_v22 = vsel %vm353_vm0, %v350_v12, %v352_v18  ;;  %v355_v23 = vsel %vm353_vm0, %v352_v18, %v350_v12  ;;  %v335_v24 = vsel %vm334_vm1, %v329_v13, %v331_v19  ;;  %v336_v25 = vsel %vm334_vm1, %v331_v19, %v329_v13 }
  0xd0   : > { %v364_v26 = vmul.f32 %v1500_v14, %v355_v23  ;;  %v345_v27 = vmul.f32 %v1503_v15, %v336_v25  ;;  %v346_v28 = vmul.f32 %v1506_v16, %v335_v24  ;;  %v365_v29 = vmul.f32 %v1509_v17, %v354_v22  ;;  %v1598_v24 = vld [vmem:[#allocation7 + $0x10] ss:$0 sm:$0xff] }
  0xd2   : > { %v371_v30 = vpop.permute.xlu1 %370  ;;  %v369_v31 = vpop.permute.xlu0 %368  ;;  %v968_v32 = vpack.c.bf16 %v365_v29, %v346_v28  ;;  %v970_v33 = vpack.c.bf16 %v364_v26, %v345_v27 }
  0xd3   : > { %v373_v39 = vsel %vm372_vm2, %v369_v31, %v371_v30  ;;  %v374_v40 = vsel %vm372_vm2, %v371_v30, %v369_v31  ;;  %v484_v31 = vld [vmem:[%s1798_s2] sm:$0xff] }
  0xd4   : > { %969 = vmatprep.subr.bf16.mxu0 %v968_v32  ;;  %v383_v47 = vmul.f32 %v1529_v35, %v374_v40  ;;  %v384_v48 = vmul.f32 %v1532_v36, %v373_v39 }
  0xd5   : > { %971 = vmatpush1.bf16.msra.mxu0 %v970_v33 }
  0xd6   : > { %v390_v41 = vpop.permute.xlu1 %389  ;;  %v388_v42 = vpop.permute.xlu0 %387 }
  0xd7   : > { %v392_v43 = vsel %vm391_vm3, %v388_v42, %v390_v41  ;;  %v393_v44 = vsel %vm391_vm3, %v390_v41, %v388_v42 }
  0xd8   : > { %v402_v49 = vmul.f32 %v1535_v37, %v393_v44  ;;  %v403_v50 = vmul.f32 %v1538_v38, %v392_v43  ;;  %v587_v43 = vld [vmem:[%s1801_s5] sm:$0xff]  ;;  %v588_v44 = vld [vmem:[%s1801_s5 + $0x8] sm:$0xff] }
  0xda   : > { %v411_v51 = vpop.permute.xlu1 %410  ;;  %v409_v52 = vpop.permute.xlu0 %408  ;;  %v972_v53 = vpack.c.bf16 %v403_v50, %v384_v48  ;;  %v974_v54 = vpack.c.bf16 %v402_v49, %v383_v47 }
  0xdb   : > { %v413_v55 = vsel %vm412_vm4, %v409_v52, %v411_v51  ;;  %v414_v56 = vsel %vm412_vm4, %v411_v51, %v409_v52 }
  0xdc   : > { %v423_v58 = vmul.f32 %v1550_v45, %v413_v55  ;;  %v424_v59 = vmul.f32 %v1553_v46, %v414_v56  ;;  %973 = vmatprep.subr.bf16.mxu0 %v972_v53 }
  0xdd   : > { %975 = vmatpush1.bf16.msra.mxu0 %v974_v54 }
  0xde   : > { %v430_v61 = vpop.permute.xlu1 %429  ;;  %v428_v62 = vpop.permute.xlu0 %427  ;;  %v976_v63 = vpack.c.bf16 %v424_v59, %v1452_v1  ;;  %v978_v3 = vpack.c.bf16 %v423_v58, %v1446_v0 }
  0xdf   : > { %v432_v1 = vsel %vm431_vm5, %v428_v62, %v430_v61  ;;  %v433_v0 = vsel %vm431_vm5, %v430_v61, %v428_v62 }
  0xe0   : > { %977 = vmatprep.subr.bf16.mxu0 %v976_v63  ;;  %v442_v10 = vmul.f32 %v1571_v4, %v432_v1  ;;  %v443_v11 = vmul.f32 %v1574_v5, %v433_v0 }
  0xe1   : > { %979 = vmatpush1.bf16.msra.mxu0 %v978_v3 }
  0xe2   : > { %v449_v9 = vpop.permute.xlu1 %448  ;;  %v447_v12 = vpop.permute.xlu0 %446 }
  0xe3   : > { %v451_v13 = vsel %vm450_vm6, %v447_v12, %v449_v9  ;;  %v452_v18 = vsel %vm450_vm6, %v449_v9, %v447_v12 }
  0xe4   : > { %v461_v19 = vmul.f32 %v1578_v6, %v451_v13  ;;  %v462_v20 = vmul.f32 %v1581_v8, %v452_v18 }
  0xe6   : > { %v468_v22 = vpop.permute.xlu1 %467  ;;  %v466_v23 = vpop.permute.xlu0 %465  ;;  %v980_v25 = vpack.c.bf16 %v462_v20, %v443_v11  ;;  %v982_v26 = vpack.c.bf16 %v461_v19, %v442_v10 }
  0xe7   : > { %v470_v27 = vsel %vm469_vm7, %v466_v23, %v468_v22  ;;  %v471_v28 = vsel %vm469_vm7, %v468_v22, %v466_v23 }
  0xe8   : > { %v481_v29 = vmul.f32 %v1596_v21, %v471_v28  ;;  %981 = vmatprep.subr.bf16.mxu0 %v980_v25  ;;  %v480_v30 = vmul.f32 %v1598_v24, %v470_v27 }
  0xe9   : > { %983 = vmatpush1.bf16.msra.mxu0 %v982_v26 }
  0xea   : > { %528 = vmatprep.subr.mxu0 %v481_v29 }
  0xed   : > { %529 = vmatpush1.msra.mxu0 %v480_v30 }
  0xee   : > { %954 = vmatmul.mubr.msk.f32.vlgmr.msra.gmra.mrb[0].mxu0 %vm508_vm8, %v484_v31 }
  0xf7   : > { %v506_v32 = vpop.permute.xlu0 %505 }
 0x1c1   : > { %v578_v33 = vpop.f32.mrb[0].mxu0 }
 0x1c2   : > { %v579_v34 = vadd.f32 %v578_v33, %v506_v32  ;;  %v580_v39 = vpop.f32.mrb[1].mxu0 }
 0x1c3   : > { %v581_v40 = vadd.f32 %v580_v39, %v506_v32 }
 0x1c4   : > { %v1610_v41 = vmax.f32 %v579_v34, 0.0 }
 0x1c5   : > { %v1612_v42 = vmax.f32 %v581_v40, 0.0 }
 0x1c6   : > { %599 = vrot.lane.b32.xlu0 %v1610_v41, %s1243_s9  ;;  %589 = vrot.lane.b32.xlu1 %v1610_v41, %s1244_s16  ;;  %585 = vst [vmem:[%s1620_s17] sm:$0xff] %v1610_v41 }
 0x1c7   : > { %586 = vst [vmem:[%s1620_s17 + $0x8] sm:$0xff] %v1612_v42 }
 0x1ca   : > { %609 = vrot.lane.b32.xlu0 %v1610_v41, %s1245_s30  ;;  %591 = vrot.lane.b32.xlu1 %v1612_v42, %s1244_s16  ;;  %s1724_s16 = scalar_lea.hbm %s1802_s6, %s966_s21 }
 0x1ce   : > { %619 = vrot.lane.b32.xlu0 %v1610_v41, %s1246_s14  ;;  %601 = vrot.lane.b32.xlu1 %v1612_v42, %s1243_s9 }
 0x1d2   : > { %631 = vrot.lane.b32.xlu0 %v1610_v41, %s1247_s15  ;;  %611 = vrot.lane.b32.xlu1 %v1612_v42, %s1245_s30  ;;  %s793_s30 = scalar_lea.sflag [#allocation6], %s1432_s10 }
 0x1d6   : > { %641 = vrot.lane.b32.xlu0 %v1610_v41, %s1248_s29  ;;  %621 = vrot.lane.b32.xlu1 %v1612_v42, %s1246_s14  ;;  %s1135_s14 = scalar_lea.vmem %s813_s12, 256 }
 0x1d7   : > { %p1136_p4 = scmp.ne.s32.totalorder %s813_s12, %s1135_s14 }
 0x1d9   : > { %p1137_p6 = pnand %p1136_p4, %p1387_p12 }
 0x1da   : > { %651 = vrot.lane.b32.xlu0 %v1610_v41, %s1251_s20  ;;  %633 = vrot.lane.b32.xlu1 %v1612_v42, %s1247_s15  ;;  %s1253_s15 = smov [#allocation9]  }
 0x1db   : > { %p1138_p8 = pneg %p1137_p6 }
 0x1de   : > { %661 = vrot.lane.b32.xlu0 %v1610_v41, %s1252_s11  ;;  %643 = vrot.lane.b32.xlu1 %v1612_v42, %s1248_s29  ;;  %s1139_s29 = sshll.u32 %s1253_s15, 4  ;;  %s1140_s29 = int_to_ptr.vmem [resolvable:$false] %s1139_s29 }
 0x1df   : > { %p1142_p10 = scmp.lt.s32.totalorder %s813_s12, %s1140_s29 }
 0x1e2   : > { %693 = vperm.xlu0 %1075, %v587_v43   ;;  %653 = vrot.lane.b32.xlu1 %v1612_v42, %s1251_s20  ;;  %s1141_s20 = scalar_lea.vmem %s1140_s29, 512 }
 0x1e3   : > { %p1143_p13 = scmp.lt.s32.totalorder %s1141_s20, %s1135_s14 }
 0x1e5   : > { %p1144_p3 = por %p1143_p13, %p1142_p10 }
 0x1e6   : > { %663 = vrot.lane.b32.xlu1 %v1612_v42, %s1252_s11 }
 0x1e7   : > { %p1145_p7 = pnand %p1144_p3, %p1138_p8 }
 0x1ea   : > { %698 = vperm.xlu1 %1076, %v588_v44  }
 0x238   : > { %v600_v47 = vpop.permute.xlu0 %599  ;;  %v590_v48 = vpop.permute.xlu1 %589 }
 0x23c   : > { %v610_v49 = vpop.permute.xlu0 %609  ;;  %v592_v50 = vpop.permute.xlu1 %591 }
 0x23d   : > { %v593_v51 = vsel %vm334_vm1, %v590_v48, %v592_v50  ;;  %v594_v52 = vsel %vm334_vm1, %v592_v50, %v590_v48 }
 0x23e   : > { %v595_v57 = vmul.f32 %v594_v52, %v1503_v15  ;;  %v596_v59 = vmul.f32 %v593_v51, %v1506_v16 }
 0x240   : > { %v620_v53 = vpop.permute.xlu0 %619  ;;  %v602_v54 = vpop.permute.xlu1 %601 }
 0x241   : > { %v603_v55 = vsel %vm353_vm0, %v600_v47, %v602_v54  ;;  %v604_v56 = vsel %vm353_vm0, %v602_v54, %v600_v47 }
 0x242   : > { %v605_v58 = vmul.f32 %v604_v56, %v1500_v14  ;;  %v606_v60 = vmul.f32 %v603_v55, %v1509_v17 }
 0x244   : > { %v612_v61 = vpop.permute.xlu1 %611  ;;  %v984_v62 = vpack.c.bf16 %v606_v60, %v596_v59  ;;  %v986_v63 = vpack.c.bf16 %v605_v58, %v595_v57  ;;  %v632_v3 = vpop.permute.xlu0 %631 }
 0x245   : > { %v613_v1 = vsel %vm372_vm2, %v610_v49, %v612_v61  ;;  %v614_v0 = vsel %vm372_vm2, %v612_v61, %v610_v49 }
 0x246   : > { %985 = vmatprep.subr.bf16.mxu1 %v984_v62  ;;  %v615_v16 = vmul.f32 %v614_v0, %v1529_v35  ;;  %v616_v17 = vmul.f32 %v613_v1, %v1532_v36 }
 0x247   : > { %987 = vmatpush1.bf16.msra.mxu1 %v986_v63 }
 0x248   : > { %v622_v9 = vpop.permute.xlu1 %621  ;;  %v642_v18 = vpop.permute.xlu0 %641 }
 0x249   : > { %v623_v14 = vsel %vm391_vm3, %v620_v53, %v622_v9  ;;  %v624_v15 = vsel %vm391_vm3, %v622_v9, %v620_v53 }
 0x24a   : > { %v625_v12 = vmul.f32 %v624_v15, %v1535_v37  ;;  %v626_v13 = vmul.f32 %v623_v14, %v1538_v38 }
 0x24c   : > { %v634_v10 = vpop.permute.xlu1 %633  ;;  %v988_v11 = vpack.c.bf16 %v626_v13, %v616_v17  ;;  %v990_v19 = vpack.c.bf16 %v625_v12, %v615_v16  ;;  %v652_v25 = vpop.permute.xlu0 %651 }
 0x24d   : > { %v635_v20 = vsel %vm412_vm4, %v632_v3, %v634_v10  ;;  %v636_v22 = vsel %vm412_vm4, %v634_v10, %v632_v3 }
 0x24e   : > { %v637_v23 = vmul.f32 %v635_v20, %v1550_v45  ;;  %v638_v35 = vmul.f32 %v636_v22, %v1553_v46  ;;  %989 = vmatprep.subr.bf16.mxu1 %v988_v11 }
 0x24f   : > { %991 = vmatpush1.bf16.msra.mxu1 %v990_v19 }
 0x250   : > { %v644_v36 = vpop.permute.xlu1 %643  ;;  %v992_v37 = vpack.c.bf16 %v638_v35, %v1612_v42  ;;  %v994_v38 = vpack.c.bf16 %v637_v23, %v1610_v41  ;;  %v662_v33 = vpop.permute.xlu0 %661 }
 0x251   : > { %v645_v26 = vsel %vm431_vm5, %v642_v18, %v644_v36  ;;  %v646_v27 = vsel %vm431_vm5, %v644_v36, %v642_v18 }
 0x252   : > { %993 = vmatprep.subr.bf16.mxu1 %v992_v37  ;;  %v647_v29 = vmul.f32 %v645_v26, %v1571_v4  ;;  %v648_v30 = vmul.f32 %v646_v27, %v1574_v5 }
 0x253   : > { %995 = vmatpush1.bf16.msra.mxu1 %v994_v38 }
 0x254   : > { %v654_v28 = vpop.permute.xlu1 %653 }
 0x255   : > { %v655_v45 = vsel %vm450_vm6, %v652_v25, %v654_v28  ;;  %v656_v46 = vsel %vm450_vm6, %v654_v28, %v652_v25 }
 0x256   : > { %v657_v31 = vmul.f32 %v655_v45, %v1578_v6  ;;  %v658_v32 = vmul.f32 %v656_v46, %v1581_v8  ;;  %v671_v6 = vld [vmem:[%s1800_s4] sm:$0xff] }
 0x258   : > { %v664_v34 = vpop.permute.xlu1 %663  ;;  %v996_v39 = vpack.c.bf16 %v658_v32, %v648_v30  ;;  %v998_v40 = vpack.c.bf16 %v657_v31, %v647_v29 }
 0x259   : > { %v666_v41 = vsel %vm469_vm7, %v664_v34, %v662_v33  ;;  %v665_v42 = vsel %vm469_vm7, %v662_v33, %v664_v34 }
 0x25a   : > { %v668_v4 = vmul.f32 %v1596_v21, %v666_v41  ;;  %997 = vmatprep.subr.bf16.mxu1 %v996_v39  ;;  %v667_v5 = vmul.f32 %v1598_v24, %v665_v42 }
 0x25b   : > { %999 = vmatpush1.bf16.msra.mxu1 %v998_v40 }
 0x25c   : > { %723 = vmatprep.subr.mxu1 %v668_v4 }
 0x25f   : > { %724 = vmatpush1.msra.mxu1 %v667_v5 }
 0x260   : > { %955 = vmatmul.mubr.msk.f32.vlgmr.msra.gmra.mrb[0].mxu1 %vm508_vm8, %v671_v6 }
 0x261   : > { %777 = vmatprep.mubr.f32.mxu1 %v1249_v2 }
 0x264   : > { %956 = vmatmul.mubr.msk.f32.gmra.mrb[2].mxu1 %vm508_vm8, %v672_v7 }
 0x265   : > { %1148 = shalt.err (!%p1145_p7)
}
 0x266   : > { %s1149_s17 = scalar_lea.hbm %s1724_s16, 256  ;;  %s1153_s23 = scalar_lea.hbm %s1802_s6, 512 }
 0x267   : > { %p1150_p9 = scmp.ne.s32.totalorder %s1724_s16, %s1149_s17  ;;  %p1154_p0 = scmp.lt.u32.totalorder %s1724_s16, %s1802_s6 }
 0x268   : > { %p1155_p11 = scmp.lt.u32.totalorder %s1153_s23, %s1149_s17  ;;  %p1157_p4 = scmp.lt.u32.totalorder %s1149_s17, %s1724_s16 }
 0x269   : > { %p1151_p2 = pnand %p1150_p9, %p1387_p12 }
 0x26a   : > { %p1156_p1 = por %p1155_p11, %p1154_p0 }
 0x26b   : > { %p1152_p5 = pneg %p1151_p2 }
 0x26c   : > { %p1158_p6 = por %p1157_p4, %p1156_p1 }
 0x26e   : > { %p1159_p8 = pnand %p1158_p6, %p1152_p5 }
 0x270   : > { %1162 = shalt.err (!%p1159_p8)
}
 0x271   : > { %1006 = dma.vmem_to_hbm [thread:$0]  (%p1387_p12), %s813_s12, 256, %s1724_s16, %s793_s30   ;;  %v694_v2 = vpop.permute.xlu0 %693  ;;  %v699_v44 = vpop.permute.xlu1 %698 }
 0x272   : > { %s951_s14 = sshll.u32 %s1432_s10, 5  ;;  %s967_s17 = sshll.u32 %s1317_s28, 9 }
 0x273   : > { %s320_s29 = scalar_lea.vmem [#allocation10], %s951_s14  ;;  %s1751_s30 = scalar_lea.hbm %s1803_s7, %s967_s17 }
 0x274   : > { %s825_s20 = sshll.u32 %s320_s29, 4  ;;  %s798_s11 = scalar_lea.sflag [#allocation11], %s1432_s10  ;;  %s1746_s20 = int_to_ptr.vmem [resolvable:$true] %s825_s20 }
 0x275   : > { %s1163_s21 = scalar_lea.vmem %s1746_s20, 512  ;;  %s1254_s28 = smov [#allocation10]  }
 0x276   : > { %p1164_p10 = scmp.ne.s32.totalorder %s1746_s20, %s1163_s21  ;;  %s1167_s23 = sshll.u32 %s1254_s28, 4  ;;  %s1168_s23 = int_to_ptr.vmem [resolvable:$false] %s1167_s23 }
 0x277   : > { %s1169_s22 = scalar_lea.vmem %s1168_s23, 1024  ;;  %p1170_p7 = scmp.lt.s32.totalorder %s1746_s20, %s1168_s23 }
 0x278   : > { %p1165_p13 = pnand %p1164_p10, %p1387_p12  ;;  %p1171_p9 = scmp.lt.s32.totalorder %s1169_s22, %s1163_s21 }
 0x27a   : > { %p1166_p3 = pneg %p1165_p13  ;;  %p1172_p2 = por %p1171_p9, %p1170_p7 }
 0x27c   : > { %p1173_p5 = pnand %p1172_p2, %p1166_p3 }
 0x333   : > { %v773_v8 = vpop.f32.mrb[0].mxu1 }
 0x334   : > { %v774_v21 = vadd.f32 %v773_v8, %v694_v2  ;;  %v775_v24 = vpop.f32.mrb[1].mxu1 }
 0x335   : > { %v776_v43 = vadd.f32 %v775_v24, %v694_v2 }
 0x336   : > { %v784_v47 = vmax.f32 %v774_v21, 0.0 }
 0x337   : > { %v785_v48 = vmax.f32 %v776_v43, 0.0  ;;  %v779_v49 = vpop.f32.mrb[2].mxu1 }
 0x338   : > { %788 = vst [vmem:[%s320_s29] sm:$0xff] %v784_v47  ;;  %v780_v50 = vadd.f32 %v779_v49, %v699_v44  ;;  %v781_v51 = vpop.f32.mrb[3].mxu1 }
 0x339   : > { %789 = vst [vmem:[%s320_s29 + $0x8] sm:$0xff] %v785_v48  ;;  %v782_v52 = vadd.f32 %v781_v51, %v699_v44 }
 0x33a   : > { %v786_v53 = vmax.f32 %v780_v50, 0.0 }
 0x33b   : > { %v787_v54 = vmax.f32 %v782_v52, 0.0 }
 0x33c   : > { %790 = vst [vmem:[%s320_s29 + $0x10] sm:$0xff] %v786_v53 }
 0x33d   : > { %791 = vst [vmem:[%s320_s29 + $0x18] sm:$0xff] %v787_v54 }
 0x33e   : > { %1176 = shalt.err (!%p1173_p5)
}
 0x33f   : > { %s1177_s15 = scalar_lea.hbm %s1751_s30, 512  ;;  %s1181_s17 = scalar_lea.hbm %s1803_s7, 1024 }
 0x340   : > { %p1178_p0 = scmp.ne.s32.totalorder %s1751_s30, %s1177_s15  ;;  %p1182_p4 = scmp.lt.u32.totalorder %s1751_s30, %s1803_s7 }
 0x341   : > { %p1183_p6 = scmp.lt.u32.totalorder %s1181_s17, %s1177_s15  ;;  %p1185_p10 = scmp.lt.u32.totalorder %s1177_s15, %s1751_s30 }
 0x342   : > { %p1179_p11 = pnand %p1178_p0, %p1387_p12 }
 0x343   : > { %p1184_p8 = por %p1183_p6, %p1182_p4 }
 0x344   : > { %p1180_p1 = pneg %p1179_p11 }
 0x345   : > { %p1186_p13 = por %p1185_p10, %p1184_p8 }
 0x347   : > { %p1187_p3 = pnand %p1186_p13, %p1180_p1 }
 0x349   : > { %1190 = shalt.err (!%p1187_p3)
}
 0x34a   : > { %s1255_s21 = smov 256  }
 0x34b   : > { %1007 = dma.vmem_to_hbm [thread:$0]  (%p1387_p12), %s1746_s20, 512, %s1751_s30, %s798_s11, %s1255_s21, %s1255_s21, %s1243_s9  }
 0x34c PF: > { %s840_s28 = sand.u32 1, %s1225_s24   ;;  %p1818_p7 = scmp.ne.s32.totalorder %s1808_s8, 0 }
 0x34d   : > { %p1819_p9 = scmp.ge.s32.totalorder %s1237_s27, 2  ;;  %s841_s23 = scalar_lea.sflag [#allocation6], %s840_s28 }
 0x34f   : > { %p1019_p2 = pnand %p1819_p9, %p1818_p7 }
 0x351   : > { %1216 = dma.done.wait (!%p1019_p2), %s841_s23, 256  }
 0x352   : > { %1218 = vsyncadd (!%p1019_p2), %s841_s23, 4294967040  ;;  %s850_s22 = scalar_lea.sflag [#allocation11], %s840_s28 }
 0x353   : > { %1220 = dma.done.wait (!%p1019_p2), %s850_s22, 512  }
 0x354   : > { %1222 = vsyncadd (!%p1019_p2), %s850_s22, 4294966784  ;;  %p25_p12 = scmp.ge.s32.totalorder %s1352_s13, 4   ;;  %s1820_s24 = smov %s1229_s25 }
 0x355   : > { %s1821_s25 = smov %s1233_s26  ;;  %s1822_s26 = smov %s1383_s18 }
 0x356   : > { %s1823_s27 = smov %s1352_s13  ;;  %27 = sbr.rel (!%p25_p12) target bundleno = 8 (0x8), region = 110 }
 0x35d   :  { %855 = vsyncpa [#allocation5], 1 }
 0x35e   :  { %857 = vsyncpa [#allocation5 + $0x1], 1 }
 0x35f   :  { %858 = vsyncpa [#allocation8], 1 }
 0x360   :  { %859 = vsyncpa [#allocation6], 1 }
 0x361   :  { %861 = vsyncpa [#allocation6 + $0x1], 1 }
 0x362   :  { %862 = vsyncpa [#allocation11], 1 }
 0x363   :  { %864 = vsyncpa [#allocation11 + $0x1], 1 }

</bundles_post_ra>
